<compile_context>
chip_gen: v7x
topology: tpu7x:2x2x1
jax: 0.10.0
libtpu: 0.0.40
codegen_flags: <defaults>
</compile_context>

<pallas_src>
import functools

import jax
import jax.numpy as jnp
from jax import lax
from jax.experimental import pallas as pl
from jax.experimental.pallas import tpu as pltpu


def _triplet_kernel(xr_ref, xc_ref, labr_ref, labc_ref, validc_ref,
                    normr_ref, invr_ref, invc_ref, loss_ref,
                    ap_min_ref, an_max_ref, *, margin):
    """One (tm, tn) tile of the (n, n) cosine-similarity matrix.

    grid = (row_blocks, col_blocks); the column axis is a running reduction whose
    per-row hard-positive min / hard-negative max are carried lane-dense in (tm,128)
    VMEM scratch and collapsed once on the last column block.
    """
    j = pl.program_id(1)

    @pl.when(j == 0)
    def _init():
        ap_min_ref[...] = jnp.full(ap_min_ref.shape, jnp.inf, jnp.float32)
        an_max_ref[...] = jnp.full(an_max_ref.shape, -jnp.inf, jnp.float32)

    # Raw Gram tile on the MXU (operands stay in the input dtype, f32 accumulation).
    s = lax.dot_general(xr_ref[...], xc_ref[...], (((1,), (1,)), ((), ())),
                        preferred_element_type=jnp.float32)            # (tm, tn)

    # Column normalization only; the per-row 1/||x_i|| factor is positive, so it
    # commutes with min/max and is applied once at finalize (saves one (tm,tn)
    # multiply per step).  Sentinels are +/-norm_r so they become +/-1 after scaling.
    sv = s * invc_ref[...]                                              # (tm,tn)*(1,tn)
    norm_r = normr_ref[...]                                             # (tm, 1)

    same = labr_ref[...] == labc_ref[...]                               # (tm, tn) bool
    valid = validc_ref[...] != 0                                        # (1, tn)  bool
    pos = jnp.logical_and(same, valid)
    neg = jnp.logical_and(jnp.logical_not(same), valid)

    ap_cand = jnp.where(pos, sv, norm_r)      # sentinel ->  sim = +1 after inv_r scale
    an_cand = jnp.where(neg, sv, -norm_r)     # sentinel ->  sim = -1 after inv_r scale

    # Lane-dense running reduction on the VPU: fold tn//128 lane chunks elementwise;
    # the only cross-lane (XLU) reduce happens at finalize.
    run_min = ap_min_ref[...]
    run_max = an_max_ref[...]
    tn = ap_cand.shape[1]
    for c in range(tn // 128):
        sl = slice(c * 128, (c + 1) * 128)
        run_min = jnp.minimum(run_min, ap_cand[:, sl])
        run_max = jnp.maximum(run_max, an_cand[:, sl])
    ap_min_ref[...] = run_min
    an_max_ref[...] = run_max

    @pl.when(j == pl.num_programs(1) - 1)
    def _finalize():
        inv_r = invr_ref[...]                                           # (tm, 1)
        # dist = -sim; hard positive = max(dist) = -min(sim); hard negative = -max(sim)
        dist_ap = -(jnp.min(ap_min_ref[...], axis=-1, keepdims=True) * inv_r)
        dist_an = -(jnp.max(an_max_ref[...], axis=-1, keepdims=True) * inv_r)
        loss_ref[...] = jnp.maximum(dist_ap - dist_an + margin, 0.0)


def _pick_block(n, pref, align):
    """Largest multiple of `align` that divides n and is <= pref (or n itself)."""
    pref = max((pref // align) * align, align)
    if n <= pref:
        return n
    b = (min(pref, n) // align) * align
    while n % b != 0:
        b -= align
    return b


def _vmem_estimate(tm, tn, d, feat_bytes):
    """Rough double-buffered VMEM footprint of one grid step (bytes)."""
    tiles = (tm * d + tn * d) * feat_bytes            # feature tiles
    vecs = (4 * tm + 3 * tn) * 4                      # label/norm vectors + output
    scratch = 2 * tm * 128 * 4                        # running min/max carries
    return 2 * (tiles + vecs) + scratch


def triplet_loss(features, labels, margin=0.3, row_block=256, col_block=512,
                 matmul_dtype=None, row_core_parallel=False):
    """features: (n, feat_dim) float, labels: (n,) int. Returns scalar float32.

    matmul_dtype: optionally cast MXU operands (e.g. jnp.bfloat16) for ~3x MXU
        throughput when accuracy allows (loosen test tolerance if used).
    row_core_parallel: set True on v7x to shard row blocks across the 2 TensorCores.
    """
    n, d = features.shape
    in_dtype = features.dtype if matmul_dtype is None else matmul_dtype
    x = features.astype(in_dtype)

    # Per-sample (inverse) norms, computed once in the wrapper (f32).
    x32 = features.astype(jnp.float32)
    sq = jnp.maximum(jnp.sum(x32 * x32, axis=-1), 1e-24)   # == max(||x||, 1e-12)**2
    norm = jnp.sqrt(sq)
    inv = 1.0 / norm

    # Pad n up to a lane multiple so both grid axes tile cleanly (no full-extent
    # fallback block).  Padded columns are excluded via `valid`; padded rows are
    # stripped before the mean.
    n_pad = ((n + 127) // 128) * 128
    pad = n_pad - n
    x = jnp.pad(x, ((0, pad), (0, 0)))
    norm = jnp.pad(norm, (0, pad), constant_values=1.0)
    inv = jnp.pad(inv, (0, pad), constant_values=1.0)
    lab = jnp.pad(labels.astype(jnp.int32), (0, pad))
    valid = (jnp.arange(n_pad, dtype=jnp.int32) < n).astype(jnp.int32)

    # Block selection with a simple VMEM budget (shrink tn before tm).
    tm = _pick_block(n_pad, row_block, 8)
    tn = _pick_block(n_pad, col_block, 128)
    feat_bytes = jnp.dtype(in_dtype).itemsize
    budget = 24 << 20
    while _vmem_estimate(tm, tn, d, feat_bytes) > budget and tn > 128:
        tn = _pick_block(n_pad, tn - 128, 128)
    while _vmem_estimate(tm, tn, d, feat_bytes) > budget and tm > 8:
        tm = _pick_block(n_pad, tm - 8, 8)

    lab_col = lab.reshape(n_pad, 1)                     # per query row
    lab_row = lab.reshape(1, n_pad)                     # per key column (lane-major)
    valid_row = valid.reshape(1, n_pad)
    norm_q = norm.reshape(n_pad, 1).astype(jnp.float32)
    inv_q = inv.reshape(n_pad, 1).astype(jnp.float32)
    inv_k = inv.reshape(1, n_pad).astype(jnp.float32)   # lane-major -> free broadcast

    row_sem = pltpu.CORE_PARALLEL if row_core_parallel else pltpu.PARALLEL

    per_row = pl.pallas_call(
        functools.partial(_triplet_kernel, margin=float(margin)),
        out_shape=jax.ShapeDtypeStruct((n_pad, 1), jnp.float32),
        grid_spec=pltpu.PrefetchScalarGridSpec(
            num_scalar_prefetch=0,
            grid=(n_pad // tm, n_pad // tn),
            in_specs=[
                pl.BlockSpec((tm, d), lambda i, j: (i, 0)),   # query rows of X
                pl.BlockSpec((tn, d), lambda i, j: (j, 0)),   # key rows of X
                pl.BlockSpec((tm, 1), lambda i, j: (i, 0)),   # labels (column vector)
                pl.BlockSpec((1, tn), lambda i, j: (0, j)),   # labels (row vector)
                pl.BlockSpec((1, tn), lambda i, j: (0, j)),   # column validity
                pl.BlockSpec((tm, 1), lambda i, j: (i, 0)),   # row norms (sentinels)
                pl.BlockSpec((tm, 1), lambda i, j: (i, 0)),   # row inverse norms
                pl.BlockSpec((1, tn), lambda i, j: (0, j)),   # col inverse norms
            ],
            out_specs=pl.BlockSpec((tm, 1), lambda i, j: (i, 0)),
            scratch_shapes=[pltpu.VMEM((tm, 128), jnp.float32),   # running min (pos)
                            pltpu.VMEM((tm, 128), jnp.float32)],  # running max (neg)
        ),
        compiler_params=pltpu.CompilerParams(
            dimension_semantics=(row_sem, pltpu.ARBITRARY),
            vmem_limit_bytes=32 * 1024 * 1024),
    )(x, x, lab_col, lab_row, valid_row, norm_q, inv_q, inv_k)

    # Strip padded rows; the final mean is one tiny XLA reduce.
    return jnp.mean(per_row[:n, 0])


def _triplet_loss_ref(features, labels, margin=0.3):
    """Pure-JAX reference mirroring the PyTorch forward."""
    x = features.astype(jnp.float32)
    xn = x / jnp.maximum(jnp.linalg.norm(x, axis=-1, keepdims=True), 1e-12)
    dist = -(xn @ xn.T)
    mask = (labels[:, None] == labels[None, :]).astype(jnp.float32)
    dist_ap = jnp.max(dist * mask - (1.0 - mask), axis=-1)
    dist_an = jnp.min(dist * (1.0 - mask) + mask, axis=-1)
    return jnp.mean(jnp.maximum(dist_ap - dist_an + margin, 0.0))


if __name__ == "__main__":
    key = jax.random.PRNGKey(0)
    kx, kl = jax.random.split(key)

    # Multi-tile grid: n=256, d=64 -> (4, 2) grid of (64, 128) similarity tiles.
    n, d = 256, 64
    features = jax.random.normal(kx, (n, d), dtype=jnp.float32)
    labels = jax.random.randint(kl, (n,), 0, 8, dtype=jnp.int32)
    loss = jax.block_until_ready(
        triplet_loss(features, labels, margin=0.3, row_block=64, col_block=128))
    ref = _triplet_loss_ref(features, labels, margin=0.3)
    assert jnp.allclose(loss, ref, atol=1e-5, rtol=1e-5), (loss, ref)

    # Tiny, unaligned batch: exercises padding (n=8 -> n_pad=128) + validity mask.
    n2, d2 = 8, 32
    f2 = jax.random.normal(jax.random.PRNGKey(1), (n2, d2), dtype=jnp.float32)
    l2 = jnp.array([0, 0, 1, 1, 2, 2, 3, 3], dtype=jnp.int32)
    loss2 = jax.block_until_ready(triplet_loss(f2, l2, margin=0.3))
    ref2 = _triplet_loss_ref(f2, l2, margin=0.3)
    assert jnp.allclose(loss2, ref2, atol=1e-5, rtol=1e-5), (loss2, ref2)

    # Unaligned n with a multi-block column sweep: n=300 -> n_pad=384, grid (3, 3).
    n3, d3 = 300, 96
    f3 = jax.random.normal(jax.random.PRNGKey(2), (n3, d3), dtype=jnp.float32)
    l3 = jax.random.randint(jax.random.PRNGKey(3), (n3,), 0, 10, dtype=jnp.int32)
    loss3 = jax.block_until_ready(
        triplet_loss(f3, l3, margin=0.3, row_block=128, col_block=128))
    ref3 = _triplet_loss_ref(f3, l3, margin=0.3)
    assert jnp.allclose(loss3, ref3, atol=1e-5, rtol=1e-5), (loss3, ref3)

    print("KERNEL_OK")
</pallas_src>

<mosaic_0001>
module attributes {stable_mosaic.version = 11 : i64} {
  func.func @_triplet_kernel(%arg0: i32, %arg1: i32, %arg2: memref<64x64xf32, #tpu.memory_space<vmem>>, %arg3: memref<128x64xf32, #tpu.memory_space<vmem>>, %arg4: memref<64x1xi32, #tpu.memory_space<vmem>>, %arg5: memref<1x128xi32, #tpu.memory_space<vmem>>, %arg6: memref<1x128xi32, #tpu.memory_space<vmem>>, %arg7: memref<64x1xf32, #tpu.memory_space<vmem>>, %arg8: memref<64x1xf32, #tpu.memory_space<vmem>>, %arg9: memref<1x128xf32, #tpu.memory_space<vmem>>, %arg10: memref<64x1xf32, #tpu.memory_space<vmem>>, %arg11: memref<64x128xf32, #tpu.memory_space<vmem>>, %arg12: memref<64x128xf32, #tpu.memory_space<vmem>>) attributes {dimension_semantics = [#tpu.dimension_semantics<parallel>, #tpu.dimension_semantics<arbitrary>], iteration_bounds = array<i64: 4, 2>, scalar_prefetch = 0 : i64, scratch_operands = 2 : i64, tpu.core_type = #tpu.core_type<tc>, window_params = [{transform_indices = @transform_0, window_bounds = array<i64: 64, 64>}, {transform_indices = @transform_1, window_bounds = array<i64: 128, 64>}, {transform_indices = @transform_2, window_bounds = array<i64: 64, 1>}, {transform_indices = @transform_3, window_bounds = array<i64: 1, 128>}, {transform_indices = @transform_4, window_bounds = array<i64: 1, 128>}, {transform_indices = @transform_5, window_bounds = array<i64: 64, 1>}, {transform_indices = @transform_6, window_bounds = array<i64: 64, 1>}, {transform_indices = @transform_7, window_bounds = array<i64: 1, 128>}, {transform_indices = @transform_8, window_bounds = array<i64: 64, 1>}]} {
    %c0_i32 = arith.constant 0 : i32
    %0 = arith.cmpi eq, %arg1, %c0_i32 : i32
    %1 = arith.extui %0 : i1 to i32
    %c0_i32_0 = arith.constant 0 : i32
    %2 = arith.cmpi ne, %1, %c0_i32_0 : i32
    scf.if %2 {
      %cst_26 = arith.constant 0x7F800000 : f32
      %40 = vector.broadcast %cst_26 : f32 to vector<64x128xf32>
      %c0_27 = arith.constant 0 : index
      %c0_28 = arith.constant 0 : index
      %41 = vector.load %arg11[%c0_27, %c0_28] : memref<64x128xf32, #tpu.memory_space<vmem>>, vector<64x128xf32>
      tpu.vector_store %arg11[%c0_27, %c0_28], %40 {strides = array<i32>} : memref<64x128xf32, #tpu.memory_space<vmem>>, vector<64x128xf32>,
      %cst_29 = arith.constant 0xFF800000 : f32
      %42 = vector.broadcast %cst_29 : f32 to vector<64x128xf32>
      %c0_30 = arith.constant 0 : index
      %c0_31 = arith.constant 0 : index
      %43 = vector.load %arg12[%c0_30, %c0_31] : memref<64x128xf32, #tpu.memory_space<vmem>>, vector<64x128xf32>
      tpu.vector_store %arg12[%c0_30, %c0_31], %42 {strides = array<i32>} : memref<64x128xf32, #tpu.memory_space<vmem>>, vector<64x128xf32>,
    } else {
    }
    %c0 = arith.constant 0 : index
    %c0_1 = arith.constant 0 : index
    %3 = vector.load %arg2[%c0, %c0_1] : memref<64x64xf32, #tpu.memory_space<vmem>>, vector<64x64xf32>
    %c0_2 = arith.constant 0 : index
    %c0_3 = arith.constant 0 : index
    %4 = vector.load %arg3[%c0_2, %c0_3] : memref<128x64xf32, #tpu.memory_space<vmem>>, vector<128x64xf32>
    %cst = arith.constant dense<0.000000e+00> : vector<64x128xf32>
    %5 = tpu.matmul %3, %4, %cst {dimension_numbers = #tpu.dot_dimension_numbers<[1], [1], [0], [0], [0, 0, 1, 0], [], []>} : vector<64x64xf32>, vector<128x64xf32>, vector<64x128xf32> -> vector<64x128xf32>
    %c0_4 = arith.constant 0 : index
    %c0_5 = arith.constant 0 : index
    %6 = vector.load %arg9[%c0_4, %c0_5] : memref<1x128xf32, #tpu.memory_space<vmem>>, vector<1x128xf32>
    %7 = vector.broadcast %6 : vector<1x128xf32> to vector<64x128xf32>
    %8 = arith.mulf %5, %7 : vector<64x128xf32>
    %c0_6 = arith.constant 0 : index
    %c0_7 = arith.constant 0 : index
    %9 = vector.load %arg7[%c0_6, %c0_7] : memref<64x1xf32, #tpu.memory_space<vmem>>, vector<64x1xf32>
    %c0_8 = arith.constant 0 : index
    %c0_9 = arith.constant 0 : index
    %10 = vector.load %arg4[%c0_8, %c0_9] : memref<64x1xi32, #tpu.memory_space<vmem>>, vector<64x1xi32>
    %c0_10 = arith.constant 0 : index
    %c0_11 = arith.constant 0 : index
    %11 = vector.load %arg5[%c0_10, %c0_11] : memref<1x128xi32, #tpu.memory_space<vmem>>, vector<1x128xi32>
    %12 = vector.broadcast %10 : vector<64x1xi32> to vector<64x128xi32>
    %13 = vector.broadcast %11 : vector<1x128xi32> to vector<64x128xi32>
    %14 = arith.cmpi eq, %12, %13 : vector<64x128xi32>
    %c0_12 = arith.constant 0 : index
    %c0_13 = arith.constant 0 : index
    %15 = vector.load %arg6[%c0_12, %c0_13] : memref<1x128xi32, #tpu.memory_space<vmem>>, vector<1x128xi32>
    %c0_i32_14 = arith.constant 0 : i32
    %16 = vector.broadcast %c0_i32_14 : i32 to vector<1x128xi32>
    %17 = arith.cmpi ne, %15, %16 : vector<1x128xi32>
    %18 = vector.broadcast %17 : vector<1x128xi1> to vector<64x128xi1>
    %19 = arith.andi %14, %18 : vector<64x128xi1>
    %cst_15 = arith.constant dense<true> : vector<64x128xi1>
    %20 = arith.xori %14, %cst_15 : vector<64x128xi1>
    %21 = vector.broadcast %17 : vector<1x128xi1> to vector<64x128xi1>
    %22 = arith.andi %20, %21 : vector<64x128xi1>
    %23 = vector.shape_cast %9 : vector<64x1xf32> to vector<64x1xf32>
    %24 = vector.broadcast %23 : vector<64x1xf32> to vector<64x128xf32>
    %25 = arith.select %19, %8, %24 : vector<64x128xi1>, vector<64x128xf32>
    %cst_16 = arith.constant 0.000000e+00 : f32
    %26 = vector.broadcast %cst_16 : f32 to vector<64x1xf32>
    %27 = arith.subf %26, %9 : vector<64x1xf32>
    %28 = vector.shape_cast %27 : vector<64x1xf32> to vector<64x1xf32>
    %29 = vector.broadcast %28 : vector<64x1xf32> to vector<64x128xf32>
    %30 = arith.select %22, %8, %29 : vector<64x128xi1>, vector<64x128xf32>
    %c0_17 = arith.constant 0 : index
    %c0_18 = arith.constant 0 : index
    %31 = vector.load %arg11[%c0_17, %c0_18] : memref<64x128xf32, #tpu.memory_space<vmem>>, vector<64x128xf32>
    %c0_19 = arith.constant 0 : index
    %c0_20 = arith.constant 0 : index
    %32 = vector.load %arg12[%c0_19, %c0_20] : memref<64x128xf32, #tpu.memory_space<vmem>>, vector<64x128xf32>
    %33 = arith.minimumf %31, %25 : vector<64x128xf32>
    %34 = arith.maximumf %32, %30 : vector<64x128xf32>
    %c0_21 = arith.constant 0 : index
    %c0_22 = arith.constant 0 : index
    %35 = vector.load %arg11[%c0_21, %c0_22] : memref<64x128xf32, #tpu.memory_space<vmem>>, vector<64x128xf32>
    tpu.vector_store %arg11[%c0_21, %c0_22], %33 {strides = array<i32>} : memref<64x128xf32, #tpu.memory_space<vmem>>, vector<64x128xf32>,
    %c0_23 = arith.constant 0 : index
    %c0_24 = arith.constant 0 : index
    %36 = vector.load %arg12[%c0_23, %c0_24] : memref<64x128xf32, #tpu.memory_space<vmem>>, vector<64x128xf32>
    tpu.vector_store %arg12[%c0_23, %c0_24], %34 {strides = array<i32>} : memref<64x128xf32, #tpu.memory_space<vmem>>, vector<64x128xf32>,
    %c1_i32 = arith.constant 1 : i32
    %37 = arith.cmpi eq, %arg1, %c1_i32 : i32
    %38 = arith.extui %37 : i1 to i32
    %c0_i32_25 = arith.constant 0 : i32
    %39 = arith.cmpi ne, %38, %c0_i32_25 : i32
    scf.if %39 {
      %c0_26 = arith.constant 0 : index
      %c0_27 = arith.constant 0 : index
      %40 = vector.load %arg8[%c0_26, %c0_27] : memref<64x1xf32, #tpu.memory_space<vmem>>, vector<64x1xf32>
      %c0_28 = arith.constant 0 : index
      %c0_29 = arith.constant 0 : index
      %41 = vector.load %arg11[%c0_28, %c0_29] : memref<64x128xf32, #tpu.memory_space<vmem>>, vector<64x128xf32>
      %cst_30 = arith.constant dense<0x7F800000> : vector<64xf32>
      %42 = vector.multi_reduction <minimumf>, %41, %cst_30 [1] : vector<64x128xf32> to vector<64xf32>
      %43 = vector.shape_cast %42 : vector<64xf32> to vector<64x1xf32>
      %44 = arith.mulf %43, %40 : vector<64x1xf32>
      %cst_31 = arith.constant 0.000000e+00 : f32
      %45 = vector.broadcast %cst_31 : f32 to vector<64x1xf32>
      %46 = arith.subf %45, %44 : vector<64x1xf32>
      %c0_32 = arith.constant 0 : index
      %c0_33 = arith.constant 0 : index
      %47 = vector.load %arg12[%c0_32, %c0_33] : memref<64x128xf32, #tpu.memory_space<vmem>>, vector<64x128xf32>
      %cst_34 = arith.constant dense<0xFF800000> : vector<64xf32>
      %48 = vector.multi_reduction <maximumf>, %47, %cst_34 [1] : vector<64x128xf32> to vector<64xf32>
      %49 = vector.shape_cast %48 : vector<64xf32> to vector<64x1xf32>
      %50 = arith.mulf %49, %40 : vector<64x1xf32>
      %cst_35 = arith.constant 0.000000e+00 : f32
      %51 = vector.broadcast %cst_35 : f32 to vector<64x1xf32>
      %52 = arith.subf %51, %50 : vector<64x1xf32>
      %53 = arith.subf %46, %52 : vector<64x1xf32>
      %cst_36 = arith.constant 3.000000e-01 : f32
      %54 = vector.broadcast %cst_36 : f32 to vector<64x1xf32>
      %55 = arith.addf %53, %54 : vector<64x1xf32>
      %cst_37 = arith.constant 0.000000e+00 : f32
      %56 = vector.broadcast %cst_37 : f32 to vector<64x1xf32>
      %57 = arith.maximumf %55, %56 : vector<64x1xf32>
      %c0_38 = arith.constant 0 : index
      %c0_39 = arith.constant 0 : index
      %58 = vector.load %arg10[%c0_38, %c0_39] : memref<64x1xf32, #tpu.memory_space<vmem>>, vector<64x1xf32>
      tpu.vector_store %arg10[%c0_38, %c0_39], %57 {strides = array<i32>} : memref<64x1xf32, #tpu.memory_space<vmem>>, vector<64x1xf32>,
    } else {
    }
    return
  }
  func.func @transform_0(%arg0: i32, %arg1: i32) -> (i32, i32) {
    %c0_i32 = arith.constant 0 : i32
    %c0_i32_0 = arith.constant 0 : i32
    return %arg0, %c0_i32 : i32, i32
  }
  func.func @transform_1(%arg0: i32, %arg1: i32) -> (i32, i32) {
    %c0_i32 = arith.constant 0 : i32
    %c0_i32_0 = arith.constant 0 : i32
    return %arg1, %c0_i32 : i32, i32
  }
  func.func @transform_2(%arg0: i32, %arg1: i32) -> (i32, i32) {
    %c0_i32 = arith.constant 0 : i32
    %c0_i32_0 = arith.constant 0 : i32
    return %arg0, %c0_i32 : i32, i32
  }
  func.func @transform_3(%arg0: i32, %arg1: i32) -> (i32, i32) {
    %c0_i32 = arith.constant 0 : i32
    %c0_i32_0 = arith.constant 0 : i32
    return %c0_i32, %arg1 : i32, i32
  }
  func.func @transform_4(%arg0: i32, %arg1: i32) -> (i32, i32) {
    %c0_i32 = arith.constant 0 : i32
    %c0_i32_0 = arith.constant 0 : i32
    return %c0_i32, %arg1 : i32, i32
  }
  func.func @transform_5(%arg0: i32, %arg1: i32) -> (i32, i32) {
    %c0_i32 = arith.constant 0 : i32
    %c0_i32_0 = arith.constant 0 : i32
    return %arg0, %c0_i32 : i32, i32
  }
  func.func @transform_6(%arg0: i32, %arg1: i32) -> (i32, i32) {
    %c0_i32 = arith.constant 0 : i32
    %c0_i32_0 = arith.constant 0 : i32
    return %arg0, %c0_i32 : i32, i32
  }
  func.func @transform_7(%arg0: i32, %arg1: i32) -> (i32, i32) {
    %c0_i32 = arith.constant 0 : i32
    %c0_i32_0 = arith.constant 0 : i32
    return %c0_i32, %arg1 : i32, i32
  }
  func.func @transform_8(%arg0: i32, %arg1: i32) -> (i32, i32) {
    %c0_i32 = arith.constant 0 : i32
    %c0_i32_0 = arith.constant 0 : i32
    return %arg0, %c0_i32 : i32, i32
  }
}

</mosaic_0001>

<bundles_post_ra>
// kernel: tpu_custom_call.1
= control target key start
LH: loop header
LB: loop body
LE: loop exit
PB: predicated region body
PF: predicated region fallthrough
CT: control target
= control target key end

     0   :  { %s1507_s27 = smov 0   ;;  %s1509_s28 = smov 0   ;;  %s2014_s0 = inlined_call_operand.vmem [shape: f32[256,64], index: 0, kind: input, shape index: {}]   ;;  %s2015_s1 = inlined_call_operand.vmem [shape: f32[256,64], index: 1, kind: input, shape index: {}]   ;;  %s2016_s2 = inlined_call_operand.vmem [shape: s32[256,1], index: 2, kind: input, shape index: {}]   ;;  %s2017_s3 = inlined_call_operand.vmem [shape: s32[1,256], index: 3, kind: input, shape index: {}]   ;;  %s2018_s4 = inlined_call_operand.vmem [shape: s32[1,256], index: 4, kind: input, shape index: {}]   ;;  %s2019_s5 = inlined_call_operand.vmem [shape: f32[256,1], index: 5, kind: input, shape index: {}]   ;;  %s2020_s6 = inlined_call_operand.vmem [shape: f32[256,1], index: 6, kind: input, shape index: {}]   ;;  %s2021_s7 = inlined_call_operand.vmem [shape: f32[1,256], index: 7, kind: input, shape index: {}]   ;;  %s2022_s8 = inlined_call_operand.vmem [shape: f32[256,1], index: 8, kind: output, shape index: {}]  }
   0x1   :  { %2026 = sst [smem:[#allocation5_spill]] %s2014_s0  ;;  %s1511_s29 = smov 0  }
   0x2   :  { %2027 = sst [smem:[#allocation6_spill]] %s2015_s1  ;;  %s1513_s30 = smov 0  }
   0x3   :  { %2028 = sst [smem:[#allocation7_spill]] %s2016_s2  ;;  %s1515_s9 = smov 0  }
   0x4   :  { %2029 = sst [smem:[#allocation8_spill]] %s2019_s5 }
   0x5 LB: > { %s27_s10 = sadd.s32 1, %s1448_s29  ;;  %s30_s11 = sadd.s32 1, %s1452_s30  ;;  %s1456_s9 = sphi %s1515_s9, %s18_s9   ;;  %s1452_s30 = sphi %s1513_s30, %s2086_s30   ;;  %s1448_s29 = sphi %s1511_s29, %s2085_s29   ;;  %s1444_s28 = sphi %s1509_s28, %s2084_s28   ;;  %s1440_s27 = sphi %s1507_s27, %s2083_s27  }
   0x6   : > { %p28_p0 = scmp.ge.s32.totalorder %s27_s10, 2  ;;  %p1197_p1 = scmp.ge.s32.totalorder %s1456_s9, 1 }
   0x7   : > { %p343_p2 = scmp.lt.s32.totalorder %s1456_s9, 9 }
   0x8   : > { %s2088_s10 = smov (%p28_p0, %s27_s10), 0  ;;  %s2090_s11 = smov (!%p28_p0, %s30_s11), %s1452_s30 }
   0x9   : > { %p344_p3 = pnand %p1197_p1, %p343_p2  ;;  %p32_p4 = scmp.ge.s32.totalorder %s2090_s11, 4 }
   0xa   : > { %s1198_s12 = sshll.u32 (!%p344_p3), %s1444_s28, 3  ;;  %s1200_s13 = sshll.u32 (!%p344_p3), %s1440_s27, 4 }
   0xb   : > { %s2092_s11 = smov (%p32_p4, %s2090_s11), 0  ;;  %347 = sbr.rel (%p344_p3) target bundleno = 513 (0x201), region = 52 }
   0xc   : > { %2030 = sst [smem:[#allocation4_spill]] %s2092_s11  ;;  %p407_p5 = scmp.lt.s32.totalorder (!%p344_p3), %s1198_s12, 31 }
   0xd   : > { %p413_p6 = scmp.lt.s32.totalorder (!%p344_p3), %s1200_s13, 31  ;;  %p424_p7 = scmp.lt.s32.totalorder (!%p344_p3), %s1440_s27, 1 }
   0xe   : > { %s2031_s0 = sld [smem:[#allocation5_spill]] (!%p344_p3)  ;;  %s2032_s1 = sld [smem:[#allocation6_spill]] (!%p344_p3) }
   0xf   : > { %s2033_s2 = sld [smem:[#allocation7_spill]] (!%p344_p3)  ;;  %s2034_s5 = sld [smem:[#allocation8_spill]] (!%p344_p3) }
  0x10   : > { %p1210_p8 = scmp.ne.s32.totalorder (!%p344_p3), %s1440_s27, 0 }
  0x12   : > { %s2094_s12 = smov (!%p407_p5, %s1198_s12), 31  ;;  %s2096_s13 = smov (!%p413_p6, %s1200_s13), 31 }
  0x13   : > { %s1199_s14 = sshll.u32 %s2094_s12, 3  ;;  %s1201_s18 = sshll.u32 %s2096_s13, 3  ;;  %v1458_v0 = vmov (!%p1210_p8), inf   ;;  %v1459_v1 = vmov (!%p1210_p8), -inf  }
  0x14   : > { %s1544_s17 = scalar_lea.vmem %s2031_s0, %s1199_s14  ;;  %s1549_s21 = scalar_lea.vmem %s2032_s1, %s1201_s18  ;;  %455 = vst [vmem:[#allocation2] sm:$0xff] (!%p1210_p8), %v1458_v0  ;;  %456 = vst [vmem:[#allocation2 + $0x8] sm:$0xff] (!%p1210_p8), %v1458_v0 }
  0x15   : > { %s1554_s24 = scalar_lea.vmem %s2033_s2, %s1199_s14  ;;  %s1562_s12 = scalar_lea.vmem %s2034_s5, %s1199_s14  ;;  %457 = vst [vmem:[#allocation2 + $0x10] sm:$0xff] (!%p1210_p8), %v1458_v0  ;;  %458 = vst [vmem:[#allocation2 + $0x18] sm:$0xff] (!%p1210_p8), %v1458_v0 }
  0x16   : > { %s1557_s25 = scalar_select %p424_p7, %s1440_s27, 1 }
  0x17   : > { %s1567_s16 = scalar_lea.vmem %s2020_s6, %s1199_s14  ;;  %s1584_s11 = scalar_lea.vmem %s2022_s8, %s1199_s14  ;;  %459 = vst [vmem:[#allocation2 + $0x20] sm:$0xff] (!%p1210_p8), %v1458_v0  ;;  %460 = vst [vmem:[#allocation2 + $0x28] sm:$0xff] (!%p1210_p8), %v1458_v0 }
  0x18   : > { %s426_s20 = scalar_lea.vmem %s2017_s3, %s1557_s25  ;;  %s429_s0 = scalar_lea.vmem %s2018_s4, %s1557_s25  ;;  %461 = vst [vmem:[#allocation2 + $0x30] sm:$0xff] (!%p1210_p8), %v1458_v0  ;;  %462 = vst [vmem:[#allocation2 + $0x38] sm:$0xff] (!%p1210_p8), %v1458_v0 }
  0x19   : > { %s444_s28 = scalar_lea.vmem %s2021_s7, %s1557_s25  ;;  %454 = sbr.rel (%p1210_p8) target bundleno = 32 (0x20), region = 56  ;;  %463 = vst [vmem:[#allocation3] sm:$0xff] (!%p1210_p8), %v1459_v1  ;;  %464 = vst [vmem:[#allocation3 + $0x8] sm:$0xff] (!%p1210_p8), %v1459_v1 }
  0x1a   : > { %465 = vst [vmem:[#allocation3 + $0x10] sm:$0xff] (!%p1210_p8), %v1459_v1  ;;  %466 = vst [vmem:[#allocation3 + $0x18] sm:$0xff] (!%p1210_p8), %v1459_v1 }
  0x1b   : > { %467 = vst [vmem:[#allocation3 + $0x20] sm:$0xff] (!%p1210_p8), %v1459_v1  ;;  %468 = vst [vmem:[#allocation3 + $0x28] sm:$0xff] (!%p1210_p8), %v1459_v1 }
  0x1c   : > { %469 = vst [vmem:[#allocation3 + $0x30] sm:$0xff] (!%p1210_p8), %v1459_v1  ;;  %470 = vst [vmem:[#allocation3 + $0x38] sm:$0xff] (!%p1210_p8), %v1459_v1 }
  0x20 PF: > { %v479_v2 = vld [vmem:[%s1549_s21] sm:$0xff]  ;;  %v480_v3 = vld [vmem:[%s1549_s21 + $0x8] sm:$0xff]  ;;  %vm495_vm0 = vcmask 523264   ;;  %v481_v4 = vld [vmem:[%s1549_s21 + $0x10] sm:$0xff]  ;;  %v1460_v8 = vmov 0   ;;  %vm2023_vm8 = vmmov 1  }
  0x21   : > { %v1308_v5 = vpack.c.bf16 %v480_v3, %v479_v2  ;;  %vm1592_vm1 = vmpackc.low %vm495_vm0, %vm495_vm0  ;;  %v482_v7 = vld [vmem:[%s1549_s21 + $0x18] sm:$0xff]  ;;  %1417 = vset.pattern.permute.xlu1 %v1460_v8  ;;  %1416 = vset.pattern.permute.xlu0 %v1460_v8  ;;  %v471_v10 = vld [vmem:[%s1544_s17] sm:$0xff]  ;;  %p1237_p9 = scmp.ne.s32.totalorder %s1440_s27, 1 }
  0x22   : > { %v1314_v9 = vpack.c.bf16 %v482_v7, %v481_v4  ;;  %v483_v11 = vld [vmem:[%s1549_s21 + $0x20] sm:$0xff]  ;;  %v484_v12 = vld [vmem:[%s1549_s21 + $0x28] sm:$0xff]  ;;  %1296 = vmatprep.mubr.msk.f32.mxu0 %vm495_vm0, %v471_v10  ;;  %v698_v14 = vld [vmem:[%s1554_s24 + $0x10] sm:$0xff] }
  0x23   : > { %1310 = vmatprep.subr.msk.bf16.mxu0 %vm1592_vm1, %v1308_v5  ;;  %1356 = vmatprep.subr.msk.bf16.mxu1 %vm1592_vm1, %v1308_v5  ;;  %v475_v13 = vld [vmem:[%s1544_s17 + $0x20] sm:$0xff]  ;;  %v1320_v16 = vpack.c.bf16 %v484_v12, %v483_v11  ;;  %v699_v17 = vld [vmem:[%s1554_s24 + $0x18] sm:$0xff]  ;;  %v697_v18 = vld [vmem:[%s1554_s24 + $0x8] sm:$0xff] }
  0x24   : > { %1313 = vmatpush3.bf16.xpose.msk.msra.mxu0 %vm1592_vm1, %v1308_v5  ;;  %1364 = vmatpush3.bf16.xpose.msk.msra.mxu1 %vm1592_vm1, %v1308_v5  ;;  %v696_v15 = vld [vmem:[%s1554_s24] sm:$0xff]  ;;  %v485_v19 = vld [vmem:[%s1549_s21 + $0x30] sm:$0xff]  ;;  %v486_v20 = vld [vmem:[%s1549_s21 + $0x38] sm:$0xff] }
  0x25   : > { %1316 = vmatprep.subr.msk.bf16.mxu0 %vm1592_vm1, %v1314_v9  ;;  %1357 = vmatprep.subr.msk.bf16.mxu1 %vm1592_vm1, %v1314_v9  ;;  %v701_v21 = vld [vmem:[%s1554_s24 + $0x28] sm:$0xff]  ;;  %v700_v22 = vld [vmem:[%s1554_s24 + $0x20] sm:$0xff]  ;;  %v1326_v23 = vpack.c.bf16 %v486_v20, %v485_v19  ;;  %v703_v24 = vld [vmem:[%s1554_s24 + $0x38] sm:$0xff] }
  0x26   : > { %1302 = vmatprep.mubr.msk.f32.mxu1 %vm495_vm0, %v475_v13  ;;  %712 = vperm.xlu1 %1417, %v698_v14   ;;  %v702_v25 = vld [vmem:[%s1554_s24 + $0x30] sm:$0xff]  ;;  %v487_v26 = vld [vmem:[%s1549_s21 + $0x40] sm:$0xff]  ;;  %v488_v27 = vld [vmem:[%s1549_s21 + $0x48] sm:$0xff] }
  0x27   : > { %706 = vperm.xlu0 %1416, %v696_v15   ;;  %v689_v28 = vld [vmem:[%s1562_s12 + $0x8] sm:$0xff]  ;;  %v688_v29 = vld [vmem:[%s1562_s12] sm:$0xff]  ;;  %v1332_v30 = vpack.c.bf16 %v488_v27, %v487_v26  ;;  %v691_v31 = vld [vmem:[%s1562_s12 + $0x18] sm:$0xff] }
  0x28   : > { %v690_v32 = vld [vmem:[%s1562_s12 + $0x10] sm:$0xff]  ;;  %v490_v34 = vld [vmem:[%s1549_s21 + $0x58] sm:$0xff]  ;;  %v693_v35 = vld [vmem:[%s1562_s12 + $0x28] sm:$0xff]  ;;  %v822_v42 = vsub.f32 0.0, %v689_v28  ;;  %v821_v43 = vsub.f32 0.0, %v688_v29  ;;  %v824_v45 = vsub.f32 0.0, %v691_v31 }
  0x29   : > { %v489_v33 = vld [vmem:[%s1549_s21 + $0x50] sm:$0xff]  ;;  %v692_v36 = vld [vmem:[%s1562_s12 + $0x20] sm:$0xff]  ;;  %v695_v38 = vld [vmem:[%s1562_s12 + $0x38] sm:$0xff]  ;;  %v823_v46 = vsub.f32 0.0, %v690_v32  ;;  %v826_v49 = vsub.f32 0.0, %v693_v35 }
  0x2a   : > { %715 = vperm.xlu1 %1417, %v699_v17   ;;  %v1338_v37 = vpack.c.bf16 %v490_v34, %v489_v33  ;;  %v694_v39 = vld [vmem:[%s1562_s12 + $0x30] sm:$0xff]  ;;  %v491_v40 = vld [vmem:[%s1549_s21 + $0x60] sm:$0xff]  ;;  %v492_v41 = vld [vmem:[%s1549_s21 + $0x68] sm:$0xff]  ;;  %v825_v50 = vsub.f32 0.0, %v692_v36  ;;  %v828_v52 = vsub.f32 0.0, %v695_v38  ;;  %v2055_v33 = vmov 0 }
  0x2b   : > { %709 = vperm.xlu0 %1416, %v697_v18   ;;  %v1344_v44 = vpack.c.bf16 %v492_v41, %v491_v40  ;;  %v493_v47 = vld [vmem:[%s1549_s21 + $0x70] sm:$0xff]  ;;  %v494_v48 = vld [vmem:[%s1549_s21 + $0x78] sm:$0xff]  ;;  %v827_v53 = vsub.f32 0.0, %v694_v39  ;;  %v472_v54 = vld [vmem:[%s1544_s17 + $0x8] sm:$0xff] }
  0x2c   : > { %1319 = vmatpush3.bf16.xpose.msk.msra.mxu0 %vm1592_vm1, %v1314_v9  ;;  %1365 = vmatpush3.bf16.xpose.msk.msra.mxu1 %vm1592_vm1, %v1314_v9  ;;  %v1350_v51 = vpack.c.bf16 %v494_v48, %v493_v47  ;;  %v476_v55 = vld [vmem:[%s1544_s17 + $0x28] sm:$0xff]  ;;  %v473_v56 = vld [vmem:[%s1544_s17 + $0x10] sm:$0xff]  ;;  %v474_v58 = vld [vmem:[%s1544_s17 + $0x18] sm:$0xff]  ;;  %v744_v9 = vlaneseq }
  0x2d   : > { %1322 = vmatprep.subr.msk.bf16.mxu0 %vm1592_vm1, %v1320_v16  ;;  %1358 = vmatprep.subr.msk.bf16.mxu1 %vm1592_vm1, %v1320_v16  ;;  %v477_v57 = vld [vmem:[%s1544_s17 + $0x30] sm:$0xff]  ;;  %v478_v59 = vld [vmem:[%s1544_s17 + $0x38] sm:$0xff]  ;;  %v741_v10 = vld [vmem:[%s429_s0] sm:$0x1] }
  0x2e   : > { %721 = vperm.xlu1 %1417, %v701_v21   ;;  %v745_v12 = vshrl.u32 %v744_v9, 7  ;;  %vm742_vm2 = vcmp.ne.s32.totalorder %v741_v10, 0  ;;  %v1738_v17 = vld [vmem:[%s426_s20] ss:$0 sm:$0xff] }
  0x2f   : > { %718 = vperm.xlu0 %1416, %v700_v22   ;;  %v743_v15 = vsel %vm742_vm2, 1, %v1460_v8 }
  0x30   : > { %v746_v14 = vsub.s32 0, %v745_v12 }
  0x32   : > { %727 = vperm.xlu1 %1417, %v703_v24   ;;  %v1742_v19 = vrot.slane %v743_v15, %v746_v14 }
  0x33   : > { %724 = vperm.xlu0 %1416, %v702_v25   ;;  %v888_v25 = vld [vmem:[#allocation3 + $0x18] sm:$0xff] }
  0x34   : > { %1325 = vmatpush3.bf16.xpose.msk.msra.mxu0 %vm1592_vm1, %v1320_v16  ;;  %1366 = vmatpush3.bf16.xpose.msk.msra.mxu1 %vm1592_vm1, %v1320_v16  ;;  %vm748_vm7 = vcmp.eq.s32.totalorder %v1742_v19, 1 }
  0x35   : > { %1328 = vmatprep.subr.msk.bf16.mxu0 %vm1592_vm1, %v1326_v23  ;;  %1359 = vmatprep.subr.msk.bf16.mxu1 %vm1592_vm1, %v1326_v23 }
  0x36   : > { %780 = vperm.xlu1 %1417, %v689_v28   ;;  %v884_v28 = vld [vmem:[#allocation2 + $0x38] sm:$0xff] }
  0x37   : > { %775 = vperm.xlu0 %1416, %v688_v29  }
  0x3a   : > { %790 = vperm.xlu1 %1417, %v691_v31   ;;  %v892_v31 = vld [vmem:[#allocation3 + $0x38] sm:$0xff] }
  0x3b   : > { %785 = vperm.xlu0 %1416, %v690_v32   ;;  %v2053_v32 = vmov 0 }
  0x3c   : > { %1331 = vmatpush3.bf16.xpose.msk.msra.mxu0 %vm1592_vm1, %v1326_v23  ;;  %1367 = vmatpush3.bf16.xpose.msk.msra.mxu1 %vm1592_vm1, %v1326_v23  ;;  %v880_v23 = vld [vmem:[#allocation2 + $0x18] sm:$0xff] }
  0x3d   : > { %1334 = vmatprep.subr.msk.bf16.mxu0 %vm1592_vm1, %v1332_v30  ;;  %1360 = vmatprep.subr.msk.bf16.mxu1 %vm1592_vm1, %v1332_v30 }
  0x3e   : > { %800 = vperm.xlu1 %1417, %v693_v35  }
  0x3f   : > { %795 = vperm.xlu0 %1416, %v692_v36   ;;  %v878_v36 = vld [vmem:[#allocation2 + $0x8] sm:$0xff] }
  0x42   : > { %810 = vperm.xlu1 %1417, %v695_v38  }
  0x43   : > { %805 = vperm.xlu0 %1416, %v694_v39  }
  0x44   : > { %1337 = vmatpush3.bf16.xpose.msk.msra.mxu0 %vm1592_vm1, %v1332_v30  ;;  %1368 = vmatpush3.bf16.xpose.msk.msra.mxu1 %vm1592_vm1, %v1332_v30  ;;  %v1816_v30 = vld [vmem:[%s444_s28] ss:$0 sm:$0xff] }
  0x45   : > { %1340 = vmatprep.subr.msk.bf16.mxu0 %vm1592_vm1, %v1338_v37  ;;  %1361 = vmatprep.subr.msk.bf16.mxu1 %vm1592_vm1, %v1338_v37 }
  0x46   : > { %836 = vperm.xlu1 %1417, %v822_v42   ;;  %v882_v42 = vld [vmem:[#allocation2 + $0x28] sm:$0xff] }
  0x47   : > { %831 = vperm.xlu0 %1416, %v821_v43   ;;  %v890_v43 = vld [vmem:[#allocation3 + $0x28] sm:$0xff] }
  0x4a   : > { %846 = vperm.xlu1 %1417, %v824_v45  }
  0x4b   : > { %841 = vperm.xlu0 %1416, %v823_v46  }
  0x4c   : > { %1343 = vmatpush3.bf16.xpose.msk.msra.mxu0 %vm1592_vm1, %v1338_v37  ;;  %1369 = vmatpush3.bf16.xpose.msk.msra.mxu1 %vm1592_vm1, %v1338_v37  ;;  %v886_v37 = vld [vmem:[#allocation3 + $0x8] sm:$0xff] }
  0x4d   : > { %1346 = vmatprep.subr.msk.bf16.mxu0 %vm1592_vm1, %v1344_v44  ;;  %1362 = vmatprep.subr.msk.bf16.mxu1 %vm1592_vm1, %v1344_v44 }
  0x4e   : > { %856 = vperm.xlu1 %1417, %v826_v49  }
  0x4f   : > { %851 = vperm.xlu0 %1416, %v825_v50  }
  0x52   : > { %866 = vperm.xlu1 %1417, %v828_v52  }
  0x53   : > { %861 = vperm.xlu0 %1416, %v827_v53  }
  0x54   : > { %1349 = vmatpush3.bf16.xpose.msk.msra.mxu0 %vm1592_vm1, %v1344_v44  ;;  %1370 = vmatpush3.bf16.xpose.msk.msra.mxu1 %vm1592_vm1, %v1344_v44 }
  0x55   : > { %1352 = vmatprep.subr.msk.bf16.mxu0 %vm1592_vm1, %v1350_v51  ;;  %1363 = vmatprep.subr.msk.bf16.mxu1 %vm1592_vm1, %v1350_v51 }
  0x5c   : > { %1355 = vmatpush3.bf16.xpose.msk.msra.mxu0 %vm1592_vm1, %v1350_v51  ;;  %1371 = vmatpush3.bf16.xpose.msk.msra.mxu1 %vm1592_vm1, %v1350_v51  ;;  %v877_v51 = vld [vmem:[#allocation2] sm:$0xff] }
  0x63   : > { %1297 = vmatmul.mubr.msk.f32.vlgmr.msra.gmra.mrb[0].mxu0 %vm495_vm0, %v472_v54  ;;  %1303 = vmatmul.mubr.msk.f32.vlgmr.msra.gmra.mrb[0].mxu1 %vm495_vm0, %v476_v55 }
  0x64   : > { %1299 = vmatprep.mubr.msk.f32.mxu0 %vm495_vm0, %v473_v56  ;;  %1305 = vmatprep.mubr.msk.f32.mxu1 %vm495_vm0, %v477_v57 }
  0x67   : > { %1300 = vmatmul.mubr.msk.f32.gmra.mrb[2].mxu0 %vm495_vm0, %v474_v58  ;;  %1306 = vmatmul.mubr.msk.f32.gmra.mrb[2].mxu1 %vm495_vm0, %v478_v59  ;;  %v885_v58 = vld [vmem:[#allocation3] sm:$0xff] }
  0x68   : > { %v881_v59 = vld [vmem:[#allocation2 + $0x20] sm:$0xff] }
  0xa5   : > { %v1707_v60 = vpop.permute.xlu1 %712 }
  0xa6   : > { %v707_v61 = vpop.permute.xlu0 %706  ;;  %vm2025_vm3 = vcmp.eq.s32.totalorder %v1707_v60, %v1738_v17 }
  0xa7   : > { %vm733_vm4 = vcmp.eq.s32.totalorder %v707_v61, %v1738_v17  ;;  %vm1754_vm9 = vmxor %vm2025_vm3, %vm2023_vm8 }
  0xa8   : > { %vm757_vm10 = vmxor %vm733_vm4, %vm2023_vm8 }
  0xa9   : > { %v716_v62 = vpop.permute.xlu1 %715  ;;  %vm1789_vm1 = vmand %vm733_vm4, %vm748_vm7 }
  0xaa   : > { %v710_v63 = vpop.permute.xlu0 %709  ;;  %vm736_vm6 = vcmp.eq.s32.totalorder %v716_v62, %v1738_v17  ;;  %vm1795_vm2 = vmand %vm757_vm10, %vm748_vm7 }
  0xab   : > { %vm734_vm5 = vcmp.eq.s32.totalorder %v710_v63, %v1738_v17  ;;  %vm1767_vm12 = vmxor %vm736_vm6, %vm2023_vm8 }
  0xac   : > { %vm758_vm11 = vmxor %vm734_vm5, %vm2023_vm8 }
  0xad   : > { %v722_v0 = vpop.permute.xlu1 %721  ;;  %vm1774_vm14 = vmand %vm734_vm5, %vm748_vm7 }
  0xae   : > { %v719_v1 = vpop.permute.xlu0 %718  ;;  %vm738_vm13 = vcmp.eq.s32.totalorder %v722_v0, %v1738_v17  ;;  %vm1780_vm15 = vmand %vm758_vm11, %vm748_vm7 }
  0xaf   : > { %vm737_vm0 = vcmp.eq.s32.totalorder %v719_v1, %v1738_v17  ;;  %vm762_vm5 = vmxor %vm738_vm13, %vm2023_vm8 }
  0xb0   : > { %vm1804_vm11 = vmand %vm738_vm13, %vm748_vm7  ;;  %vm2066_vm13 = vmmov 1  }
  0xb1   : > { %v1709_v2 = vpop.permute.xlu1 %727  ;;  %vm761_vm4 = vmxor %vm737_vm0, %vm2023_vm8 }
  0xb2   : > { %v1711_v3 = vpop.permute.xlu0 %724  ;;  %vm1820_vm10 = vmand %vm762_vm5, %vm748_vm7 }
  0xb3   : > { %vm1830_vm8 = vmand %vm736_vm6, %vm748_vm7 }
  0xb4   : > { %v2054_v32 = vsel %vm1830_vm8, 4294967295, %v2053_v32  ;;  %vm1838_vm3 = vmand %vm1767_vm12, %vm748_vm7  ;;  %vm2061_vm12 = vcmp.eq.s32.totalorder %v1707_v60, %v1738_v17  ;;  %v889_v60 = vld [vmem:[#allocation3 + $0x20] sm:$0xff] }
  0xb5   : > { %v1713_v4 = vpop.permute.xlu1 %780  ;;  %v2056_v33 = vsel %vm1838_vm3, 4294967295, %v2055_v33  ;;  %vm1844_vm5 = vmand %vm737_vm0, %vm748_vm7  ;;  %vm2067_vm3 = vcmp.eq.s32.totalorder %v1709_v2, %v1738_v17 }
  0xb6   : > { %v1715_v5 = vpop.permute.xlu0 %775  ;;  %vm1850_vm6 = vmand %vm761_vm4, %vm748_vm7 }
  0xb7   : > { %vm1861_vm0 = vmand %vm2061_vm12, %vm748_vm7  ;;  %vm739_vm12 = vcmp.eq.s32.totalorder %v1711_v3, %v1738_v17 }
  0xb8   : > { %vm1869_vm4 = vmand %vm1754_vm9, %vm748_vm7 }
  0xb9   : > { %v1717_v6 = vpop.permute.xlu1 %790  ;;  %vm1877_vm8 = vmxor %vm2067_vm3, %vm2066_vm13 }
  0xba   : > { %v1719_v7 = vpop.permute.xlu0 %785  ;;  %vm1900_vm9 = vmand %vm2067_vm3, %vm748_vm7 }
  0xbd   : > { %v1726_v11 = vpop.permute.xlu1 %800 }
  0xbe   : > { %v1728_v13 = vpop.permute.xlu0 %795 }
  0xc1   : > { %v1731_v16 = vpop.permute.xlu1 %810 }
  0xc2   : > { %v1740_v18 = vpop.permute.xlu0 %805 }
  0xc5   : > { %v837_v8 = vpop.permute.xlu1 %836 }
  0xc6   : > { %v1761_v21 = vpop.permute.xlu0 %831 }
  0xc9   : > { %v1800_v27 = vpop.permute.xlu1 %846 }
  0xca   : > { %v1808_v29 = vpop.permute.xlu0 %841 }
  0xcd   : > { %v857_v49 = vpop.permute.xlu1 %856 }
  0xce   : > { %v852_v53 = vpop.permute.xlu0 %851 }
 0x136   : > { %v1298_v35 = vpop.f32.mrb[0].mxu0  ;;  %v1304_v38 = vpop.f32.mrb[0].mxu1 }
 0x137   : > { %v681_v40 = vmul.f32 %v1298_v35, %v1816_v30  ;;  %v685_v41 = vmul.f32 %v1304_v38, %v1816_v30  ;;  %v634_v44 = vpop.f32.mrb[1].mxu0  ;;  %v654_v45 = vpop.f32.mrb[1].mxu1  ;;  %v879_v38 = vld [vmem:[#allocation2 + $0x10] sm:$0xff] }
 0x138   : > { %v680_v50 = vmul.f32 %v1816_v30, %v634_v44  ;;  %v684_v52 = vmul.f32 %v1816_v30, %v654_v45 }
 0x139   : > { %v814_v54 = vsel %vm1774_vm14, %v681_v40, %v1713_v4  ;;  %v870_v55 = vsel %vm1780_vm15, %v681_v40, %v837_v8  ;;  %v818_v56 = vsel %vm1804_vm11, %v685_v41, %v1726_v11  ;;  %v874_v57 = vsel %vm1820_vm10, %v685_v41, %v857_v49  ;;  %vm1908_vm14 = vmand %vm1877_vm8, %vm748_vm7  ;;  %v887_v40 = vld [vmem:[#allocation3 + $0x10] sm:$0xff] }
 0x13a   : > { %v894_v62 = vmin.f32 %v878_v36, %v814_v54  ;;  %v902_v63 = vmax.f32 %v886_v37, %v870_v55  ;;  %v898_v0 = vmin.f32 %v882_v42, %v818_v56  ;;  %v906_v1 = vmax.f32 %v890_v43, %v874_v57  ;;  %v1301_v4 = vpop.f32.mrb[2].mxu0  ;;  %v1307_v9 = vpop.f32.mrb[2].mxu1  ;;  %vm1927_vm8 = vmxor %vm739_vm12, %vm2066_vm13  ;;  %v883_v41 = vld [vmem:[#allocation2 + $0x30] sm:$0xff] }
 0x13b   : > { %v813_v2 = vsel %vm1789_vm1, %v680_v50, %v1715_v5  ;;  %v869_v11 = vsel %vm1795_vm2, %v680_v50, %v1761_v21  ;;  %v817_v12 = vsel %vm1844_vm5, %v684_v52, %v1728_v13  ;;  %v873_v14 = vsel %vm1850_vm6, %v684_v52, %v852_v53  ;;  %v644_v15 = vpop.f32.mrb[3].mxu0  ;;  %v664_v8 = vpop.f32.mrb[3].mxu1  ;;  %vm1940_vm15 = vmand %vm739_vm12, %vm748_vm7  ;;  %v891_v42 = vld [vmem:[#allocation3 + $0x30] sm:$0xff] }
 0x13c   : > { %910 = vst [vmem:[#allocation2 + $0x8] sm:$0xff] %v894_v62  ;;  %918 = vst [vmem:[#allocation3 + $0x8] sm:$0xff] %v902_v63  ;;  %v893_v5 = vmin.f32 %v877_v51, %v813_v2  ;;  %v901_v21 = vmax.f32 %v885_v58, %v869_v11  ;;  %v897_v13 = vmin.f32 %v881_v59, %v817_v12  ;;  %v867_v37 = vpop.permute.xlu1 %866  ;;  %vm2078_vm1 = vnez %v2054_v32  ;;  %v862_v32 = vpop.permute.xlu0 %861  ;;  %v929_v11 = vld [vmem:[%s1567_s16] sm:$0xff] (!%p1237_p9)  ;;  %v930_v12 = vld [vmem:[%s1567_s16 + $0x8] sm:$0xff] (!%p1237_p9) }
 0x13d   : > { %914 = vst [vmem:[#allocation2 + $0x28] sm:$0xff] %v898_v0  ;;  %922 = vst [vmem:[#allocation3 + $0x28] sm:$0xff] %v906_v1  ;;  %v905_v22 = vmax.f32 %v889_v60, %v873_v14  ;;  %v683_v24 = vmul.f32 %v1301_v4, %v1816_v30  ;;  %v687_v26 = vmul.f32 %v1307_v9, %v1816_v30  ;;  %vm2079_vm2 = vnez %v2056_v33 }
 0x13e   : > { %v682_v34 = vmul.f32 %v1816_v30, %v644_v15  ;;  %v686_v35 = vmul.f32 %v1816_v30, %v664_v8  ;;  %909 = vst [vmem:[#allocation2] sm:$0xff] %v893_v5  ;;  %917 = vst [vmem:[#allocation3] sm:$0xff] %v901_v21  ;;  %v931_v8 = vld [vmem:[%s1567_s16 + $0x10] sm:$0xff] (!%p1237_p9)  ;;  %v932_v5 = vld [vmem:[%s1567_s16 + $0x18] sm:$0xff] (!%p1237_p9) }
 0x13f   : > { %913 = vst [vmem:[#allocation2 + $0x20] sm:$0xff] %v897_v13  ;;  %921 = vst [vmem:[#allocation3 + $0x20] sm:$0xff] %v905_v22  ;;  %v816_v39 = vsel %vm2078_vm1, %v683_v24, %v1717_v6  ;;  %v872_v30 = vsel %vm2079_vm2, %v683_v24, %v1800_v27  ;;  %v820_v3 = vsel %vm1900_vm9, %v687_v26, %v1731_v16  ;;  %928 = sbr.rel (%p1237_p9) target bundleno = 513 (0x201), region = 60 }
 0x140   : > { %v876_v17 = vsel %vm1908_vm14, %v687_v26, %v867_v37  ;;  %vm1959_vm11 = vmand %vm1927_vm8, %vm748_vm7  ;;  %v896_v27 = vmin.f32 %v880_v23, %v816_v39  ;;  %v904_v33 = vmax.f32 %v888_v25, %v872_v30  ;;  %v900_v43 = vmin.f32 %v884_v28, %v820_v3  ;;  %v933_v39 = vld [vmem:[%s1567_s16 + $0x20] sm:$0xff] (!%p1237_p9) }
 0x141   : > { %v908_v44 = vmax.f32 %v892_v31, %v876_v17  ;;  %v815_v16 = vsel %vm1861_vm0, %v682_v34, %v1719_v7  ;;  %v871_v45 = vsel %vm1869_vm4, %v682_v34, %v1808_v29  ;;  %v819_v19 = vsel %vm1940_vm15, %v686_v35, %v1740_v18 }
 0x142   : > { %v875_v48 = vsel %vm1959_vm11, %v686_v35, %v862_v32  ;;  %912 = vst [vmem:[#allocation2 + $0x18] sm:$0xff] %v896_v27  ;;  %920 = vst [vmem:[#allocation3 + $0x18] sm:$0xff] %v904_v33  ;;  %v895_v49 = vmin.f32 %v879_v38, %v815_v16  ;;  %v903_v50 = vmax.f32 %v887_v40, %v871_v45  ;;  %v934_v38 = vld [vmem:[%s1567_s16 + $0x28] sm:$0xff] (!%p1237_p9)  ;;  %v936_v16 = vld [vmem:[%s1567_s16 + $0x38] sm:$0xff] (!%p1237_p9)  ;;  %vm1041_vm7 = vcmask (!%p1237_p9), 7168  }
 0x143   : > { %916 = vst [vmem:[#allocation2 + $0x38] sm:$0xff] %v900_v43  ;;  %924 = vst [vmem:[#allocation3 + $0x38] sm:$0xff] %v908_v44  ;;  %v899_v51 = vmin.f32 %v883_v41, %v819_v19  ;;  %v907_v46 = vmax.f32 %v891_v42, %v875_v48  ;;  %v938_v47 = vld [vmem:[#allocation2 + $0x8] sm:$0xff] (!%p1237_p9)  ;;  %v935_v45 = vld [vmem:[%s1567_s16 + $0x30] sm:$0xff] (!%p1237_p9) }
 0x144   : > { %911 = vst [vmem:[#allocation2 + $0x10] sm:$0xff] %v895_v49  ;;  %919 = vst [vmem:[#allocation3 + $0x10] sm:$0xff] %v903_v50  ;;  %v942_v52 = vld [vmem:[#allocation2 + $0x28] sm:$0xff] (!%p1237_p9) }
 0x145   : > { %915 = vst [vmem:[#allocation2 + $0x30] sm:$0xff] %v899_v51  ;;  %923 = vst [vmem:[#allocation3 + $0x30] sm:$0xff] %v907_v46  ;;  %v937_v18 = vld [vmem:[#allocation2] sm:$0xff] (!%p1237_p9)  ;;  %v978_v56 = vld [vmem:[#allocation3 + $0x8] sm:$0xff] (!%p1237_p9) }
 0x146   : > { %945 = vmin.xlane.f32.xlu0 %v937_v18  ;;  %v941_v53 = vld [vmem:[#allocation2 + $0x20] sm:$0xff]  ;;  %v982_v60 = vld [vmem:[#allocation3 + $0x28] sm:$0xff] }
 0x147   : > { %v977_v57 = vld [vmem:[#allocation3] sm:$0xff] }
 0x148   : > { %v981_v61 = vld [vmem:[#allocation3 + $0x20] sm:$0xff] }
 0x149   : > { %v940_v29 = vld [vmem:[#allocation2 + $0x18] sm:$0xff] }
 0x14a   : > { %947 = vmin.xlane.f32.xlu0 %v938_v47  ;;  %v944_v54 = vld [vmem:[#allocation2 + $0x38] sm:$0xff] }
 0x14b   : > { %v939_v7 = vld [vmem:[#allocation2 + $0x10] sm:$0xff]  ;;  %v980_v58 = vld [vmem:[#allocation3 + $0x18] sm:$0xff] }
 0x14c   : > { %949 = vmin.xlane.f32.xlu1 %v939_v7  ;;  %v943_v55 = vld [vmem:[#allocation2 + $0x30] sm:$0xff]  ;;  %v984_v62 = vld [vmem:[#allocation3 + $0x38] sm:$0xff] }
 0x14d   : > { %v979_v59 = vld [vmem:[#allocation3 + $0x10] sm:$0xff] }
 0x14e   : > { %953 = vmin.xlane.f32.xlu0 %v941_v53  ;;  %v983_v63 = vld [vmem:[#allocation3 + $0x30] sm:$0xff] }
 0x150   : > { %951 = vmin.xlane.f32.xlu1 %v940_v29 }
 0x152   : > { %957 = vmin.xlane.f32.xlu0 %v943_v55 }
 0x154   : > { %955 = vmin.xlane.f32.xlu1 %v942_v52 }
 0x156   : > { %985 = vmax.xlane.f32.xlu0 %v977_v57 }
 0x158   : > { %959 = vmin.xlane.f32.xlu1 %v944_v54 }
 0x15a   : > { %989 = vmax.xlane.f32.xlu0 %v979_v59 }
 0x15c   : > { %987 = vmax.xlane.f32.xlu1 %v978_v56 }
 0x15e   : > { %993 = vmax.xlane.f32.xlu0 %v981_v61 }
 0x160   : > { %991 = vmax.xlane.f32.xlu1 %v980_v58 }
 0x162   : > { %997 = vmax.xlane.f32.xlu0 %v983_v63 }
 0x164   : > { %995 = vmax.xlane.f32.xlu1 %v982_v60 }
 0x168   : > { %999 = vmax.xlane.f32.xlu1 %v984_v62 }
 0x1d3   : > { %v946_v1 = vpop.xlane.xlu0 %945 }
 0x1d4   : > { %v961_v20 = vmul.f32 %v946_v1, %v929_v11 }
 0x1d6   : > { %v969_v28 = vsub.f32 0.0, %v961_v20 }
 0x1d7   : > { %v948_v9 = vpop.xlane.xlu0 %947 }
 0x1d8   : > { %v962_v21 = vmul.f32 %v948_v9, %v930_v12 }
 0x1d9   : > { %v950_v0 = vpop.xlane.xlu1 %949 }
 0x1da   : > { %v963_v25 = vmul.f32 %v950_v0, %v931_v8  ;;  %v970_v31 = vsub.f32 0.0, %v962_v21 }
 0x1db   : > { %v954_v2 = vpop.xlane.xlu0 %953 }
 0x1dc   : > { %v971_v41 = vsub.f32 0.0, %v963_v25  ;;  %v965_v44 = vmul.f32 %v954_v2, %v933_v39 }
 0x1dd   : > { %v952_v4 = vpop.xlane.xlu1 %951 }
 0x1de   : > { %v964_v26 = vmul.f32 %v952_v4, %v932_v5  ;;  %v973_v55 = vsub.f32 0.0, %v965_v44 }
 0x1df   : > { %v958_v15 = vpop.xlane.xlu0 %957 }
 0x1e0   : > { %v972_v42 = vsub.f32 0.0, %v964_v26  ;;  %v967_v47 = vmul.f32 %v958_v15, %v935_v45 }
 0x1e1   : > { %v956_v10 = vpop.xlane.xlu1 %955 }
 0x1e2   : > { %v966_v43 = vmul.f32 %v956_v10, %v934_v38  ;;  %v975_v9 = vsub.f32 0.0, %v967_v47 }
 0x1e3   : > { %v986_v22 = vpop.xlane.xlu0 %985 }
 0x1e4   : > { %v1001_v24 = vmul.f32 %v986_v22, %v929_v11  ;;  %v974_v54 = vsub.f32 0.0, %v966_v43 }
 0x1e5   : > { %v960_v14 = vpop.xlane.xlu1 %959 }
 0x1e6   : > { %v1009_v35 = vsub.f32 0.0, %v1001_v24  ;;  %v968_v29 = vmul.f32 %v960_v14, %v936_v16 }
 0x1e7   : > { %v990_v37 = vpop.xlane.xlu0 %989 }
 0x1e8   : > { %v1017_v3 = vsub.f32 %v969_v28, %v1009_v35  ;;  %v1003_v40 = vmul.f32 %v990_v37, %v931_v8  ;;  %v976_v4 = vsub.f32 0.0, %v968_v29 }
 0x1e9   : > { %v988_v13 = vpop.xlane.xlu1 %987 }
 0x1ea   : > { %v1002_v23 = vmul.f32 %v988_v13, %v930_v12  ;;  %v1025_v32 = vadd.f32 0.3, %v1017_v3  ;;  %v1011_v33 = vsub.f32 0.0, %v1003_v40 }
 0x1eb   : > { %v994_v48 = vpop.xlane.xlu0 %993 }
 0x1ec   : > { %v1010_v34 = vsub.f32 0.0, %v1002_v23  ;;  %v1033_v50 = vmax.f32 %v1025_v32, 0.0  ;;  %v1019_v46 = vsub.f32 %v971_v41, %v1011_v33  ;;  %v1005_v18 = vmul.f32 %v994_v48, %v933_v39 }
 0x1ed   : > { %v992_v36 = vpop.xlane.xlu1 %991 }
 0x1ee   : > { %v1018_v30 = vsub.f32 %v970_v31, %v1010_v34  ;;  %v1004_v17 = vmul.f32 %v992_v36, %v932_v5  ;;  %1042 = vst.msk [vmem:[%s1584_s11] sm:$0xff] %vm1041_vm7, %v1033_v50  ;;  %v1027_v53 = vadd.f32 0.3, %v1019_v46  ;;  %v1013_v57 = vsub.f32 0.0, %v1005_v18 }
 0x1ef   : > { %v998_v59 = vpop.xlane.xlu0 %997 }
 0x1f0   : > { %v1026_v6 = vadd.f32 0.3, %v1018_v30  ;;  %v1012_v27 = vsub.f32 0.0, %v1004_v17  ;;  %v1035_v61 = vmax.f32 %v1027_v53, 0.0  ;;  %v1007_v63 = vmul.f32 %v998_v59, %v935_v45 }
 0x1f1   : > { %v996_v19 = vpop.xlane.xlu1 %995  ;;  %v1021_v1 = vsub.f32 %v973_v55, %v1013_v57 }
 0x1f2   : > { %v1034_v49 = vmax.f32 %v1026_v6, 0.0  ;;  %v1020_v51 = vsub.f32 %v972_v42, %v1012_v27  ;;  %v1006_v7 = vmul.f32 %v996_v19, %v934_v38  ;;  %1044 = vst.msk [vmem:[%s1584_s11 + $0x10] sm:$0xff] %vm1041_vm7, %v1035_v61  ;;  %v1015_v2 = vsub.f32 0.0, %v1007_v63 }
 0x1f3   : > { %v1029_v12 = vadd.f32 0.3, %v1021_v1 }
 0x1f4   : > { %1043 = vst.msk [vmem:[%s1584_s11 + $0x8] sm:$0xff] %vm1041_vm7, %v1034_v49  ;;  %v1028_v52 = vadd.f32 0.3, %v1020_v51  ;;  %v1014_v56 = vsub.f32 0.0, %v1006_v7  ;;  %v1023_v15 = vsub.f32 %v975_v9, %v1015_v2 }
 0x1f5   : > { %v1000_v58 = vpop.xlane.xlu1 %999  ;;  %v1037_v20 = vmax.f32 %v1029_v12, 0.0 }
 0x1f6   : > { %v1036_v60 = vmax.f32 %v1028_v52, 0.0  ;;  %v1008_v62 = vmul.f32 %v1000_v58, %v936_v16  ;;  %v1022_v0 = vsub.f32 %v974_v54, %v1014_v56  ;;  %v1031_v21 = vadd.f32 0.3, %v1023_v15 }
 0x1f7   : > { %1046 = vst.msk [vmem:[%s1584_s11 + $0x20] sm:$0xff] %vm1041_vm7, %v1037_v20 }
 0x1f8   : > { %1045 = vst.msk [vmem:[%s1584_s11 + $0x18] sm:$0xff] %vm1041_vm7, %v1036_v60  ;;  %v1016_v10 = vsub.f32 0.0, %v1008_v62  ;;  %v1030_v11 = vadd.f32 0.3, %v1022_v0  ;;  %v1039_v22 = vmax.f32 %v1031_v21, 0.0 }
 0x1fa   : > { %v1024_v14 = vsub.f32 %v976_v4, %v1016_v10  ;;  %v1038_v8 = vmax.f32 %v1030_v11, 0.0  ;;  %1048 = vst.msk [vmem:[%s1584_s11 + $0x30] sm:$0xff] %vm1041_vm7, %v1039_v22 }
 0x1fc   : > { %v1032_v5 = vadd.f32 0.3, %v1024_v14  ;;  %1047 = vst.msk [vmem:[%s1584_s11 + $0x28] sm:$0xff] %vm1041_vm7, %v1038_v8 }
 0x1fe   : > { %v1040_v13 = vmax.f32 %v1032_v5, 0.0 }
 0x200   : > { %1049 = vst.msk [vmem:[%s1584_s11 + $0x38] sm:$0xff] %vm1041_vm7, %v1040_v13 }
 0x201 PF: > { %s18_s9 = sadd.s32 1, %s1456_s9   ;;  %s2082_s21 = sld [smem:[#allocation4_spill]] }
 0x202   : > { %p15_p10 = scmp.ge.s32.totalorder %s18_s9, 10   ;;  %s2083_s27 = smov %s1448_s29 }
 0x203   : > { %s2084_s28 = smov %s1452_s30  ;;  %s2085_s29 = smov %s2088_s10 }
 0x204   :  { %17 = sbr.rel (!%p15_p10) target bundleno = 5 (0x5), region = 111 }
 0x207   : > { %s2086_s30 = smov %s2082_s21 }

</bundles_post_ra>
